<compile_context>
chip_gen: v6e
topology: v6e:2x2x1
jax: 0.10.0
libtpu: 0.0.40
codegen_flags: <defaults>
</compile_context>

<pallas_src>
import jax
import jax.numpy as jnp
from jax.experimental import pallas as pl
from jax.experimental.pallas import tpu as pltpu


def _locked_dropout_kernel(x_ref, mask_ref, o_ref):
    # x_ref: (t_block, n_block); mask_ref: (1, n_block) float32, broadcast over
    # the sublane axis. Mask stays f32; the product is cast once to out dtype.
    o_ref[...] = (x_ref[...] * mask_ref[...]).astype(o_ref.dtype)


def _tile_target_bytes():
    """Per-generation DMA tile budget. Pallas double-buffers in+out blocks
    (~4x tile resident), so stay at 2 MiB on v5e (16 MiB default scoped VMEM)
    and 4 MiB on v6e/v7x."""
    try:
        kind = jax.devices()[0].device_kind.lower()
    except Exception:
        return 2 << 20
    if ("v5 lite" in kind) or ("v5e" in kind) or ("v5lite" in kind):
        return 2 << 20
    return 4 << 20


def _choose_blocks(T, BH, itemsize, target_bytes):
    """Pick (t_block, n_block): n_block a multiple of 128 along lanes,
    t_block a multiple of 8 along sublanes (or the full dim when smaller),
    with t_block * n_block * itemsize <= target_bytes whenever possible."""
    # Lanes first: as wide as the budget allows assuming >= 8 sublane rows.
    lanes_budget = max(128, (target_bytes // max(8 * itemsize, 1)) // 128 * 128)
    n_block = min(BH, lanes_budget)
    n_block = max(128, (n_block // 128) * 128)
    # Rows second: fill the remaining budget.
    max_rows = max(1, target_bytes // (n_block * itemsize))
    if T <= max_rows:
        t_block = T                       # full dim (legal even if not 8-aligned)
    else:
        t_block = max(8, (max_rows // 8) * 8)
    return t_block, n_block


def locked_dropout(x, seed, dropout_rate=0.5, training=True, *,
                   t_block=None, n_block=None, force_pallas=False,
                   donate_x=False):
    """LockedDropout forward. x: (T, B, H). A single (1, B, H) keep-mask,
    scaled by 1/keep_prob, is shared across the T axis."""
    if (not training) or dropout_rate == 0.0:
        return x
    if dropout_rate >= 1.0:
        # keep_prob == 0: everything is dropped (avoids 1/0 at trace time).
        return jnp.zeros_like(x)

    T, B, H = x.shape
    BH = B * H
    keep_prob = 1.0 - dropout_rate
    itemsize = jnp.dtype(x.dtype).itemsize

    # Mask generated once in plain JAX, kept in float32 (no double-rounding
    # of the 1/keep_prob scale for narrow dtypes), resident via constant-j map.
    key = jax.random.PRNGKey(seed)
    keep = jax.random.bernoulli(key, p=keep_prob, shape=(1, BH))
    mask = keep.astype(jnp.float32) * jnp.float32(1.0 / keep_prob)

    lane_aligned = (BH % 128 == 0)
    tiny = T * BH * itemsize < (256 << 10)
    if not force_pallas and (not lane_aligned or tiny):
        # Misaligned last dim forces masked vst.msk partial stores, and launch
        # overhead dominates tiny inputs — let XLA fuse the multiply instead.
        y = x.reshape(T, BH).astype(jnp.float32) * mask
        return y.astype(x.dtype).reshape(T, B, H)

    target = _tile_target_bytes()
    if lane_aligned:
        auto_t, auto_n = _choose_blocks(T, BH, itemsize, target)
    else:
        # Forced Pallas path on a misaligned lane dim: full-width lane block
        # (legal: block equals the full array dim), budget the rows only.
        auto_n = BH
        max_rows = max(1, target // max(BH * itemsize, 1))
        auto_t = T if T <= max_rows else max(8, (max_rows // 8) * 8)
    if t_block is None:
        t_block = auto_t
    if n_block is None:
        n_block = auto_n

    x2d = x.reshape(T, BH)  # lane-dense view: B*H -> lanes, T -> sublanes
    grid = (pl.cdiv(T, t_block), pl.cdiv(BH, n_block))
    bytes_accessed = 2 * T * BH * itemsize + BH * 4

    out2d = pl.pallas_call(
        _locked_dropout_kernel,
        out_shape=jax.ShapeDtypeStruct((T, BH), x.dtype),
        grid=grid,
        in_specs=[
            pl.BlockSpec((t_block, n_block), lambda i, j: (i, j)),
            pl.BlockSpec((1, n_block), lambda i, j: (0, j)),
        ],
        out_specs=pl.BlockSpec((t_block, n_block), lambda i, j: (i, j)),
        compiler_params=pltpu.CompilerParams(
            # Disjoint output blocks on both axes -> v7x megacore can shard
            # grid steps across its two TensorCores; no-op on v5e/v6e.
            dimension_semantics=("parallel", "parallel"),
        ),
        cost_estimate=pl.CostEstimate(
            flops=T * BH, transcendentals=0, bytes_accessed=bytes_accessed),
        input_output_aliases=({0: 0} if donate_x else {}),
    )(x2d, mask)

    return out2d.reshape(T, B, H)


if __name__ == "__main__":
    key = jax.random.PRNGKey(0)
    T, B, H = 8, 4, 32          # small: seq=8, batch=4, hidden=32 (B*H = 128)
    x = jax.random.normal(key, (T, B, H), dtype=jnp.float32)

    dropout_rate = 0.5
    keep_prob = 1.0 - dropout_rate
    seed = 1234

    # force_pallas=True so the tiny demo shape actually exercises the kernel.
    y = locked_dropout(x, seed=seed, dropout_rate=dropout_rate, training=True,
                       force_pallas=True)
    y = jax.block_until_ready(y)

    # 1) every element is either 0 or x / keep_prob
    ratio = jnp.where(x != 0, y / x, 0.0)
    ok_vals = bool(jnp.all((jnp.abs(ratio) < 1e-6)
                           | (jnp.abs(ratio - 1.0 / keep_prob) < 1e-5)))

    # 2) the mask is identical ("locked") across the time axis
    mask_t0 = jnp.where(x[0] != 0, y[0] / x[0], 0.0)
    locked = True
    for t in range(1, T):
        mask_t = jnp.where(x[t] != 0, y[t] / x[t], 0.0)
        locked = locked and bool(jnp.allclose(mask_t, mask_t0, atol=1e-5))

    # 3) matches a plain-JAX reference built from the same seed
    ref_keep = jax.random.bernoulli(jax.random.PRNGKey(seed), p=keep_prob,
                                    shape=(1, B * H))
    ref_mask = (ref_keep.astype(jnp.float32) / keep_prob).reshape(1, B, H)
    ref = (x * ref_mask).astype(x.dtype)
    ref_ok = bool(jnp.allclose(y, ref, atol=1e-6))

    # 4) multi-block 2D grid path (forced small tiles) still matches
    T2, B2, H2 = 16, 4, 64       # B*H = 256 -> grid (2, 2) with 8x128 tiles
    x2 = jax.random.normal(jax.random.PRNGKey(1), (T2, B2, H2), jnp.float32)
    y2 = locked_dropout(x2, seed=seed, dropout_rate=dropout_rate, training=True,
                        force_pallas=True, t_block=8, n_block=128)
    y2 = jax.block_until_ready(y2)
    keep2 = jax.random.bernoulli(jax.random.PRNGKey(seed), p=keep_prob,
                                 shape=(1, B2 * H2))
    ref2 = x2 * (keep2.astype(jnp.float32) / keep_prob).reshape(1, B2, H2)
    grid_ok = bool(jnp.allclose(y2, ref2, atol=1e-6))

    # 5) eval mode / zero rate is identity; rate=1.0 zeros everything
    identity_ok = bool(jnp.array_equal(
        locked_dropout(x, seed=seed, dropout_rate=dropout_rate, training=False),
        x))
    all_zero_ok = bool(jnp.array_equal(
        locked_dropout(x, seed=seed, dropout_rate=1.0, training=True),
        jnp.zeros_like(x)))

    assert ok_vals, "mask values not in {0, 1/keep_prob}"
    assert locked, "mask not locked across time axis"
    assert ref_ok, "kernel output mismatch vs plain-JAX reference"
    assert grid_ok, "multi-block (2,2) grid output mismatch"
    assert identity_ok, "eval mode must be identity"
    assert all_zero_ok, "dropout_rate=1.0 must zero the output"

    print("KERNEL_OK")
</pallas_src>

<mosaic_0001>
module attributes {stable_mosaic.version = 11 : i64} {
  func.func @_locked_dropout_kernel(%arg0: i32, %arg1: i32, %arg2: memref<8x128xf32, #tpu.memory_space<vmem>>, %arg3: memref<1x128xf32, #tpu.memory_space<vmem>>, %arg4: memref<8x128xf32, #tpu.memory_space<vmem>>) attributes {dimension_semantics = [#tpu.dimension_semantics<parallel>, #tpu.dimension_semantics<parallel>], iteration_bounds = array<i64: 1, 1>, scalar_prefetch = 0 : i64, scratch_operands = 0 : i64, tpu.core_type = #tpu.core_type<tc>, window_params = [{transform_indices = @transform_0, window_bounds = array<i64: 8, 128>}, {transform_indices = @transform_1, window_bounds = array<i64: 1, 128>}, {transform_indices = @transform_2, window_bounds = array<i64: 8, 128>}]} {
    %c0 = arith.constant 0 : index
    %c0_0 = arith.constant 0 : index
    %0 = vector.load %arg2[%c0, %c0_0] : memref<8x128xf32, #tpu.memory_space<vmem>>, vector<8x128xf32>
    %c0_1 = arith.constant 0 : index
    %c0_2 = arith.constant 0 : index
    %1 = vector.load %arg3[%c0_1, %c0_2] : memref<1x128xf32, #tpu.memory_space<vmem>>, vector<1x128xf32>
    %2 = vector.broadcast %1 : vector<1x128xf32> to vector<8x128xf32>
    %3 = arith.mulf %0, %2 : vector<8x128xf32>
    %c0_3 = arith.constant 0 : index
    %c0_4 = arith.constant 0 : index
    %4 = vector.load %arg4[%c0_3, %c0_4] : memref<8x128xf32, #tpu.memory_space<vmem>>, vector<8x128xf32>
    tpu.vector_store %arg4[%c0_3, %c0_4], %3 {strides = array<i32>} : memref<8x128xf32, #tpu.memory_space<vmem>>, vector<8x128xf32>,
    return
  }
  func.func @transform_0(%arg0: i32, %arg1: i32) -> (i32, i32) {
    %c0_i32 = arith.constant 0 : i32
    return %arg0, %arg1 : i32, i32
  }
  func.func @transform_1(%arg0: i32, %arg1: i32) -> (i32, i32) {
    %c0_i32 = arith.constant 0 : i32
    %c0_i32_0 = arith.constant 0 : i32
    return %c0_i32, %arg1 : i32, i32
  }
  func.func @transform_2(%arg0: i32, %arg1: i32) -> (i32, i32) {
    %c0_i32 = arith.constant 0 : i32
    return %arg0, %arg1 : i32, i32
  }
}

</mosaic_0001>

<bundles_post_ra>
// kernel: tpu_custom_call.1
= control target key start
LH: loop header
LB: loop body
LE: loop exit
PB: predicated region body
PF: predicated region fallthrough
CT: control target
= control target key end

     0   :  { %7 = vsyncpa [#allocation3], 0  ;;  %s122_s0 = inlined_call_operand.hbm [shape: f32[8,128], index: 0, kind: input, shape index: {}]   ;;  %s123_s1 = inlined_call_operand.vmem [shape: f32[1,128], index: 1, kind: input, shape index: {}]   ;;  %s124_s2 = inlined_call_operand.hbm [shape: f32[8,128], index: 2, kind: output, shape index: {}]  }
   0x1   :  { %8 = vsyncpa [#allocation4], 0  ;;  %s96_s9 = smov [#allocation2]  }
   0x2   :  { %s15_s10 = sshll.u32 %s96_s9, 4  ;;  %s16_s10 = int_to_ptr.vmem [resolvable:$true] %s15_s10 }
   0x3   :  { %s60_s11 = scalar_lea.vmem %s16_s10, 128  ;;  %p65_p1 = scmp.lt.s32.totalorder %s16_s10, %s16_s10 }
   0x4   :  { %p61_p0 = scmp.ne.s32.totalorder %s16_s10, %s60_s11  ;;  %p66_p2 = scmp.lt.s32.totalorder %s60_s11, %s60_s11 }
   0x6   :  { %p67_p3 = por %p66_p2, %p65_p1 }
   0x8   :  { %p68_p4 = pnand %p67_p3, %p61_p0 }
   0xa   :  { %71 = shalt.err (!%p68_p4)
}
   0xb   :  { %18 = dma.hbm_to_vmem [thread:$0]  %s122_s0, 128, %s16_s10, [#allocation3]  }
   0xc   :  { %92 = dma.done.wait [#allocation3], 128  }
   0xd   :  { %93 = vsyncadd [#allocation3], 4294967168  ;;  %s97_s14 = smov [#allocation5]   ;;  %v24_v0 = vld [vmem:[#allocation2] sm:$0xff] }
   0xe   :  { %s40_s15 = sshll.u32 %s97_s14, 4  ;;  %v49_v1 = vld [vmem:[%s123_s1] ss:$0 sm:$0xff]  ;;  %s41_s15 = int_to_ptr.vmem [resolvable:$true] %s40_s15 }
   0xf   :  { %v32_v2 = vmul.f32 %v49_v1, %v24_v0  ;;  %s72_s18 = scalar_lea.vmem %s41_s15, 128  ;;  %p77_p6 = scmp.lt.s32.totalorder %s41_s15, %s41_s15 }
  0x10   :  { %p73_p5 = scmp.ne.s32.totalorder %s41_s15, %s72_s18  ;;  %p78_p7 = scmp.lt.s32.totalorder %s72_s18, %s72_s18 }
  0x11   :  { %33 = vst [vmem:[#allocation5] sm:$0xff] %v32_v2 }
  0x12   :  { %p79_p8 = por %p78_p7, %p77_p6 }
  0x14   :  { %p80_p9 = pnand %p79_p8, %p73_p5 }
  0x16   :  { %83 = shalt.err (!%p80_p9)
}
  0x17   :  { %43 = dma.vmem_to_hbm [thread:$0]  %s41_s15, 128, %s124_s2, [#allocation4]  }
  0x18   :  { %94 = dma.done.wait [#allocation4], 128  }
  0x19   :  { %95 = vsyncadd [#allocation4], 4294967168 }
  0x1a   :  { %47 = vsyncpa [#allocation3], 1 }
  0x1b   :  { %48 = vsyncpa [#allocation4], 1 }

</bundles_post_ra>
